<compile_context>
chip_gen: v7x
topology: tpu7x:2x2x1
jax: 0.10.0
libtpu: 0.0.40
codegen_flags: <defaults>
</compile_context>

<pallas_src>
import functools

import jax
import jax.numpy as jnp
from jax import lax
from jax.experimental import pallas as pl
from jax.experimental.pallas import tpu as pltpu

_MIB = 1024 * 1024


def _round_up(x, m):
    return ((x + m - 1) // m) * m


def _tpu_info():
    try:
        return pltpu.get_tpu_info()
    except Exception:
        return None


def _detect_num_tensorcores():
    """TensorCores per chip (2 only on v7x-class chips). Conservative default 1."""
    info = _tpu_info()
    if info is not None:
        for name in ("num_tensorcores", "tensorcores_per_chip", "num_cores",
                     "cores_per_chip"):
            try:
                v = int(getattr(info, name))
            except (AttributeError, TypeError, ValueError):
                continue
            if v in (1, 2):
                return v
    return 1


def _detect_vmem_bytes():
    info = _tpu_info()
    if info is not None:
        for name in ("vmem_capacity_bytes", "vmem_bytes", "vmem_size_bytes"):
            try:
                v = int(getattr(info, name))
            except (AttributeError, TypeError, ValueError):
                continue
            if v > 0:
                return v
    return 128 * _MIB


def _contrastive_kernel(x1_ref, x2_ref, t_ref, out_ref, *scratch, margin,
                        batch, tb, npc, d_total, td, nd, need_row_mask):
    c = pl.program_id(0)          # core axis
    i = pl.program_id(1)          # batch-block axis
    k = pl.program_id(2)          # feature-block axis (size 1 unless D is huge)
    loss_acc = scratch[-1]        # (tb, 1) f32 per-core running per-row losses

    @pl.when(jnp.logical_and(i == 0, k == 0))
    def _():
        loss_acc[...] = jnp.zeros_like(loss_acc)

    # Stream the embeddings in their storage dtype, cast to f32 in-register.
    diff = x2_ref[...].astype(jnp.float32) - x1_ref[...].astype(jnp.float32)
    if nd > 1 and d_total % td != 0:
        # Last feature block overhangs D: zero the garbage columns.
        col = k * td + lax.broadcasted_iota(jnp.int32, diff.shape, 1)
        diff = jnp.where(col < d_total, diff, 0.0)
    partial = jnp.sum(diff * diff, axis=1, keepdims=True)        # (tb, 1)

    def finish(d):
        t = t_ref[...].astype(jnp.float32)                        # (tb, 1)
        hinge = jnp.maximum(margin - jnp.sqrt(d), 0.0)
        h2 = 0.9 * (hinge * hinge)
        # == 0.1*t*d + 0.9*(1-t)*hinge^2, factored to shorten the column chain.
        losses = h2 + t * (0.1 * d - h2)
        if need_row_mask:
            # Remainder / phantom rows (reads are garbage-padded): force to 0.
            row = (c * npc + i) * tb + lax.broadcasted_iota(
                jnp.int32, losses.shape, 0)
            losses = jnp.where(row < batch, losses, 0.0)
        loss_acc[...] += losses

    if nd == 1:
        finish(partial)
    else:
        d_acc = scratch[0]        # (tb, 1) f32 squared-distance accumulator

        @pl.when(k == 0)
        def _():
            d_acc[...] = jnp.zeros_like(d_acc)

        d_acc[...] += partial

        @pl.when(k == nd - 1)
        def _():
            finish(d_acc[...])

    # One cross-sublane reduce + scalar SMEM store per core, at the very end.
    @pl.when(jnp.logical_and(i == npc - 1, k == nd - 1))
    def _():
        out_ref[0, 0] = jnp.sum(loss_acc[...])


def contrastive_loss(output1, output2, target, margin, size_average=True,
                     block_rows=None, num_cores=None):
    """Pallas TPU implementation of ContrastiveLoss.forward.

    output1/output2: (B, D) float arrays; target: (B,) labels (1 = same class).
    Returns a scalar float32.
    """
    B, D = output1.shape
    assert output2.shape == (B, D)
    assert target.shape == (B,)

    dtype = output1.dtype
    itemsize = jnp.dtype(dtype).itemsize
    sub = 8 if itemsize >= 4 else (16 if itemsize == 2 else 32)

    if num_cores is None:
        num_cores = _detect_num_tensorcores()
    vmem_cap = _detect_vmem_bytes()

    # Generation-aware VMEM budget: v7x-class chips only have 64 MiB physical.
    if vmem_cap <= 64 * _MIB:
        working_budget, vmem_limit = 16 * _MIB, 32 * _MIB
    else:
        working_budget, vmem_limit = 32 * _MIB, 64 * _MIB
    vmem_limit = min(vmem_limit, vmem_cap)

    # Per-batch-row VMEM bytes (lane-padded layout): 2 embeddings x 2 pipeline
    # buffers, plus the f32 (tb,1) column buffers (target x2 + two scratches).
    col_bytes = 4 * 128 * 4                                   # 2048 + headroom
    full_per_row = 4 * _round_up(D, 128) * itemsize + col_bytes + 512

    if full_per_row * sub <= working_budget:
        td, nd = D, 1                                         # full, unpadded D
        per_row = full_per_row
    else:
        # Very large D: tile the feature axis (innermost reduction grid axis).
        td = ((working_budget // sub - col_bytes - 512) // (4 * itemsize))
        td = max(128, (td // 128) * 128)
        nd = pl.cdiv(D, td)
        per_row = 4 * td * itemsize + col_bytes + 512

    tb = working_budget // per_row
    if block_rows is not None:
        tb = min(tb, block_rows)
    if tb >= B:
        tb = B                                  # single block == full batch dim
    else:
        tb = max(sub, (tb // sub) * sub)        # multiple of the sublane packing

    nb_total = pl.cdiv(B, tb)
    nb = _round_up(nb_total, num_cores)
    npc = nb // num_cores
    ragged = nb != nb_total                     # phantom blocks on some core
    need_row_mask = (B % tb != 0) or ragged

    def emb_map(c, i, k):
        blk = c * npc + i
        if ragged:
            blk = jnp.minimum(blk, nb_total - 1)   # keep phantom DMAs in bounds
        return (blk, k)

    def tgt_map(c, i, k):
        blk = c * npc + i
        if ragged:
            blk = jnp.minimum(blk, nb_total - 1)
        return (blk, 0)

    t = target.reshape(B, 1).astype(jnp.float32)

    kernel = functools.partial(
        _contrastive_kernel, margin=float(margin), batch=B, tb=tb, npc=npc,
        d_total=D, td=td, nd=nd, need_row_mask=need_row_mask)

    scratch_shapes = []
    if nd > 1:
        scratch_shapes.append(pltpu.VMEM((tb, 1), jnp.float32))   # d_acc
    scratch_shapes.append(pltpu.VMEM((tb, 1), jnp.float32))       # loss_acc

    core_sem = pltpu.CORE_PARALLEL if num_cores > 1 else "arbitrary"

    cost = pl.CostEstimate(
        flops=B * (3 * D + 12),
        transcendentals=B,
        bytes_accessed=2 * B * D * itemsize + 4 * B + 4 * num_cores,
    )

    partials = pl.pallas_call(
        kernel,
        out_shape=jax.ShapeDtypeStruct((num_cores, 1), jnp.float32),
        grid_spec=pltpu.PrefetchScalarGridSpec(
            num_scalar_prefetch=0,
            grid=(num_cores, npc, nd),
            in_specs=[
                pl.BlockSpec((tb, td), emb_map),
                pl.BlockSpec((tb, td), emb_map),
                pl.BlockSpec((tb, 1), tgt_map),
            ],
            out_specs=pl.BlockSpec((1, 1), lambda c, i, k: (c, 0),
                                   memory_space=pltpu.SMEM),
            scratch_shapes=scratch_shapes,
        ),
        compiler_params=pltpu.CompilerParams(
            dimension_semantics=(core_sem, "arbitrary", "arbitrary"),
            vmem_limit_bytes=vmem_limit,
        ),
        cost_estimate=cost,
    )(output1, output2, t)

    total = jnp.sum(partials)
    if size_average:
        total = total * (1.0 / B)   # divide by the true batch size, once
    return total


def contrastive_loss_ref(output1, output2, target, margin, size_average=True):
    """Pure-JAX reference matching the PyTorch module exactly."""
    d = jnp.sum((output2 - output1) ** 2, axis=1)
    loss_sim = target.astype(jnp.float32) * d
    loss_dis = (1 - target).astype(jnp.float32) * \
        jnp.maximum(margin - jnp.sqrt(d), 0.0) ** 2
    losses = 0.1 * loss_sim + 0.9 * loss_dis
    return jnp.mean(losses) if size_average else jnp.sum(losses)


if __name__ == "__main__":
    key = jax.random.PRNGKey(0)
    k1, k2, kt = jax.random.split(key, 3)

    B, D = 20, 32
    margin = 1.0

    output1 = jax.random.normal(k1, (B, D), dtype=jnp.float32)
    output2 = jax.random.normal(k2, (B, D), dtype=jnp.float32)
    target = jax.random.bernoulli(kt, 0.5, (B,)).astype(jnp.int32)

    ref_mean = contrastive_loss_ref(output1, output2, target, margin, True)
    ref_sum = contrastive_loss_ref(output1, output2, target, margin, False)

    # Default config: single large block covering the whole (small) batch.
    out_mean = contrastive_loss(output1, output2, target, margin, True)
    jax.block_until_ready(out_mean)
    out_sum = contrastive_loss(output1, output2, target, margin, False)
    jax.block_until_ready(out_sum)
    # Forced small tile: exercises the multi-block pipeline + remainder row mask.
    out_blk = contrastive_loss(output1, output2, target, margin, True,
                               block_rows=8)
    jax.block_until_ready(out_blk)

    assert jnp.allclose(out_mean, ref_mean, atol=1e-5, rtol=1e-5), (out_mean, ref_mean)
    assert jnp.allclose(out_sum, ref_sum, atol=1e-4, rtol=1e-5), (out_sum, ref_sum)
    assert jnp.allclose(out_blk, ref_mean, atol=1e-5, rtol=1e-5), (out_blk, ref_mean)

    print("KERNEL_OK")
</pallas_src>

<mosaic_0001>
module attributes {stable_mosaic.version = 11 : i64} {
  func.func @_contrastive_kernel(%arg0: i32, %arg1: i32, %arg2: i32, %arg3: memref<20x32xf32, #tpu.memory_space<vmem>>, %arg4: memref<20x32xf32, #tpu.memory_space<vmem>>, %arg5: memref<20x1xf32, #tpu.memory_space<vmem>>, %arg6: memref<1x1xf32, #tpu.memory_space<smem>>, %arg7: memref<20x1xf32, #tpu.memory_space<vmem>>) attributes {dimension_semantics = [#tpu.dimension_semantics<arbitrary>, #tpu.dimension_semantics<arbitrary>, #tpu.dimension_semantics<arbitrary>], iteration_bounds = array<i64: 1, 1, 1>, scalar_prefetch = 0 : i64, scratch_operands = 1 : i64, tpu.core_type = #tpu.core_type<tc>, window_params = [{transform_indices = @transform_0, window_bounds = array<i64: 20, 32>}, {transform_indices = @transform_1, window_bounds = array<i64: 20, 32>}, {transform_indices = @transform_2, window_bounds = array<i64: 20, 1>}, {transform_indices = @transform_3, window_bounds = array<i64: 1, 1>}]} {
    %c0_i32 = arith.constant 0 : i32
    %0 = arith.cmpi eq, %arg1, %c0_i32 : i32
    %c0_i32_0 = arith.constant 0 : i32
    %1 = arith.cmpi eq, %arg2, %c0_i32_0 : i32
    %2 = arith.andi %0, %1 : i1
    %3 = arith.extui %2 : i1 to i32
    %c0_i32_1 = arith.constant 0 : i32
    %4 = arith.cmpi ne, %3, %c0_i32_1 : i32
    scf.if %4 {
      %cst_18 = arith.constant 0.000000e+00 : f32
      %33 = vector.broadcast %cst_18 : f32 to vector<20x1xf32>
      %c0_19 = arith.constant 0 : index
      %c0_20 = arith.constant 0 : index
      %34 = vector.load %arg7[%c0_19, %c0_20] : memref<20x1xf32, #tpu.memory_space<vmem>>, vector<20x1xf32>
      tpu.vector_store %arg7[%c0_19, %c0_20], %33 {strides = array<i32>} : memref<20x1xf32, #tpu.memory_space<vmem>>, vector<20x1xf32>,
    } else {
    }
    %c0 = arith.constant 0 : index
    %c0_2 = arith.constant 0 : index
    %5 = vector.load %arg4[%c0, %c0_2] : memref<20x32xf32, #tpu.memory_space<vmem>>, vector<20x32xf32>
    %c0_3 = arith.constant 0 : index
    %c0_4 = arith.constant 0 : index
    %6 = vector.load %arg3[%c0_3, %c0_4] : memref<20x32xf32, #tpu.memory_space<vmem>>, vector<20x32xf32>
    %7 = arith.subf %5, %6 : vector<20x32xf32>
    %8 = arith.mulf %7, %7 : vector<20x32xf32>
    %cst = arith.constant dense<0.000000e+00> : vector<20xf32>
    %9 = vector.multi_reduction <add>, %8, %cst [1] : vector<20x32xf32> to vector<20xf32>
    %10 = vector.shape_cast %9 : vector<20xf32> to vector<20x1xf32>
    %c0_5 = arith.constant 0 : index
    %c0_6 = arith.constant 0 : index
    %11 = vector.load %arg5[%c0_5, %c0_6] : memref<20x1xf32, #tpu.memory_space<vmem>>, vector<20x1xf32>
    %12 = math.sqrt %10 : vector<20x1xf32>
    %cst_7 = arith.constant 1.000000e+00 : f32
    %13 = vector.broadcast %cst_7 : f32 to vector<20x1xf32>
    %14 = arith.subf %13, %12 : vector<20x1xf32>
    %cst_8 = arith.constant 0.000000e+00 : f32
    %15 = vector.broadcast %cst_8 : f32 to vector<20x1xf32>
    %16 = arith.maximumf %14, %15 : vector<20x1xf32>
    %17 = arith.mulf %16, %16 : vector<20x1xf32>
    %cst_9 = arith.constant 0.899999976 : f32
    %18 = vector.broadcast %cst_9 : f32 to vector<20x1xf32>
    %19 = arith.mulf %18, %17 : vector<20x1xf32>
    %cst_10 = arith.constant 1.000000e-01 : f32
    %20 = vector.broadcast %cst_10 : f32 to vector<20x1xf32>
    %21 = arith.mulf %20, %10 : vector<20x1xf32>
    %22 = arith.subf %21, %19 : vector<20x1xf32>
    %23 = arith.mulf %11, %22 : vector<20x1xf32>
    %24 = arith.addf %19, %23 : vector<20x1xf32>
    %c0_11 = arith.constant 0 : index
    %c0_12 = arith.constant 0 : index
    %25 = vector.load %arg7[%c0_11, %c0_12] : memref<20x1xf32, #tpu.memory_space<vmem>>, vector<20x1xf32>
    %26 = arith.addf %25, %24 : vector<20x1xf32>
    %c0_13 = arith.constant 0 : index
    %c0_14 = arith.constant 0 : index
    %27 = vector.load %arg7[%c0_13, %c0_14] : memref<20x1xf32, #tpu.memory_space<vmem>>, vector<20x1xf32>
    tpu.vector_store %arg7[%c0_13, %c0_14], %26 {strides = array<i32>} : memref<20x1xf32, #tpu.memory_space<vmem>>, vector<20x1xf32>,
    %c0_i32_15 = arith.constant 0 : i32
    %28 = arith.cmpi eq, %arg1, %c0_i32_15 : i32
    %c0_i32_16 = arith.constant 0 : i32
    %29 = arith.cmpi eq, %arg2, %c0_i32_16 : i32
    %30 = arith.andi %28, %29 : i1
    %31 = arith.extui %30 : i1 to i32
    %c0_i32_17 = arith.constant 0 : i32
    %32 = arith.cmpi ne, %31, %c0_i32_17 : i32
    scf.if %32 {
      %c0_18 = arith.constant 0 : index
      %c0_19 = arith.constant 0 : index
      %33 = vector.load %arg7[%c0_18, %c0_19] : memref<20x1xf32, #tpu.memory_space<vmem>>, vector<20x1xf32>
      %34 = vector.shape_cast %33 : vector<20x1xf32> to vector<1x20x1xf32>
      %cst_20 = arith.constant dense<0.000000e+00> : vector<1xf32>
      %35 = vector.multi_reduction <add>, %34, %cst_20 [1, 2] : vector<1x20x1xf32> to vector<1xf32>
      %36 = vector.shape_cast %35 : vector<1xf32> to vector<1x1x1xf32>
      %37 = vector.extract %36[0, 0, 0] : f32 from vector<1x1x1xf32>
      %c0_21 = arith.constant 0 : index
      %c0_22 = arith.constant 0 : index
      %38 = memref.load %arg6[%c0_21, %c0_22] : memref<1x1xf32, #tpu.memory_space<smem>>
      memref.store %37, %arg6[%c0_21, %c0_22] : memref<1x1xf32, #tpu.memory_space<smem>>
    } else {
    }
    return
  }
  func.func @transform_0(%arg0: i32, %arg1: i32, %arg2: i32) -> (i32, i32) {
    %c1_i32 = arith.constant 1 : i32
    %0 = arith.muli %arg0, %c1_i32 : i32
    %1 = arith.addi %0, %arg1 : i32
    %c0_i32 = arith.constant 0 : i32
    return %1, %arg2 : i32, i32
  }
  func.func @transform_1(%arg0: i32, %arg1: i32, %arg2: i32) -> (i32, i32) {
    %c1_i32 = arith.constant 1 : i32
    %0 = arith.muli %arg0, %c1_i32 : i32
    %1 = arith.addi %0, %arg1 : i32
    %c0_i32 = arith.constant 0 : i32
    return %1, %arg2 : i32, i32
  }
  func.func @transform_2(%arg0: i32, %arg1: i32, %arg2: i32) -> (i32, i32) {
    %c1_i32 = arith.constant 1 : i32
    %0 = arith.muli %arg0, %c1_i32 : i32
    %1 = arith.addi %0, %arg1 : i32
    %c0_i32 = arith.constant 0 : i32
    %c0_i32_0 = arith.constant 0 : i32
    return %1, %c0_i32 : i32, i32
  }
  func.func @transform_3(%arg0: i32, %arg1: i32, %arg2: i32) -> (i32, i32) {
    %c0_i32 = arith.constant 0 : i32
    %c0_i32_0 = arith.constant 0 : i32
    return %arg0, %c0_i32 : i32, i32
  }
}

</mosaic_0001>

<bundles_post_ra>
// kernel: tpu_custom_call.1
= control target key start
LH: loop header
LB: loop body
LE: loop exit
PB: predicated region body
PF: predicated region fallthrough
CT: control target
= control target key end

     0   :  { %8 = vsyncpa [#allocation4], 0  ;;  %s400_s0 = inlined_call_operand.hbm [shape: f32[20,32], index: 0, kind: input, shape index: {}]   ;;  %s401_s1 = inlined_call_operand.hbm [shape: f32[20,32], index: 1, kind: input, shape index: {}]   ;;  %s402_s2 = inlined_call_operand.hbm [shape: f32[20,1], index: 2, kind: input, shape index: {}]   ;;  %s403_s3 = inlined_call_operand.hbm [shape: f32[1,1], index: 3, kind: output, shape index: {}]  }
   0x1   :  { %9 = vsyncpa [#allocation7], 0 }
   0x2   :  { %10 = vsyncpa [#allocation5], 0  ;;  %s300_s12 = smov [#allocation6]   ;;  %s301_s14 = smov [#allocation3]  }
   0x3   :  { %s36_s13 = sshll.u32 %s300_s12, 4  ;;  %s20_s15 = sshll.u32 %s301_s14, 4  ;;  %s37_s13 = int_to_ptr.vmem [resolvable:$true] %s36_s13  ;;  %s327_s15 = int_to_ptr.vmem [resolvable:$true] %s20_s15 }
   0x4   :  { %s218_s18 = scalar_lea.hbm %s401_s1, 384 }
   0x5   :  { %p219_p0 = scmp.ne.s32.totalorder %s401_s1, %s218_s18  ;;  %p222_p1 = scmp.lt.u32.totalorder %s218_s18, %s401_s1 }
   0x7   :  { %p224_p2 = pnand %p222_p1, %p219_p0 }
   0x9   :  { %227 = shalt.err (!%p224_p2)
}
   0xa   :  { %s228_s23 = scalar_lea.vmem %s37_s13, 384  ;;  %p233_p4 = scmp.lt.s32.totalorder %s37_s13, %s37_s13 }
   0xb   :  { %p229_p3 = scmp.ne.s32.totalorder %s37_s13, %s228_s23  ;;  %p234_p5 = scmp.lt.s32.totalorder %s228_s23, %s228_s23 }
   0xd   :  { %p235_p6 = por %p234_p5, %p233_p4 }
   0xf   :  { %p236_p7 = pnand %p235_p6, %p229_p3 }
  0x11   :  { %239 = shalt.err (!%p236_p7)
}
  0x12   :  { %s302_s24 = smov 128   ;;  %s303_s25 = smov 8  }
  0x13   :  { %42 = dma.hbm_to_vmem [thread:$0]  %s401_s1, 384, %s37_s13, [#allocation7], %s302_s24, %s302_s24, %s303_s25  }
  0x14   :  { %s240_s30 = scalar_lea.hbm %s400_s0, 384 }
  0x15   :  { %p241_p8 = scmp.ne.s32.totalorder %s400_s0, %s240_s30  ;;  %p244_p9 = scmp.lt.u32.totalorder %s240_s30, %s400_s0 }
  0x17   :  { %p246_p10 = pnand %p244_p9, %p241_p8 }
  0x19   :  { %249 = shalt.err (!%p246_p10)
}
  0x1a   :  { %s250_s8 = scalar_lea.vmem %s327_s15, 384  ;;  %p255_p12 = scmp.lt.s32.totalorder %s327_s15, %s327_s15 }
  0x1b   :  { %p251_p11 = scmp.ne.s32.totalorder %s327_s15, %s250_s8  ;;  %p256_p13 = scmp.lt.s32.totalorder %s250_s8, %s250_s8 }
  0x1d   :  { %p257_p0 = por %p256_p13, %p255_p12 }
  0x1f   :  { %p258_p1 = pnand %p257_p0, %p251_p11 }
  0x21   :  { %261 = shalt.err (!%p258_p1)
}
  0x22   :  { %26 = dma.hbm_to_vmem [thread:$0]  %s400_s0, 384, %s327_s15, [#allocation4], %s302_s24, %s302_s24, %s303_s25  }
  0x23   :  { %s304_s10 = smov [#allocation8]   ;;  %s262_s14 = scalar_lea.hbm %s402_s2, 384 }
  0x24   :  { %s52_s11 = sshll.u32 %s304_s10, 4  ;;  %p263_p2 = scmp.ne.s32.totalorder %s402_s2, %s262_s14  ;;  %s53_s11 = int_to_ptr.vmem [resolvable:$true] %s52_s11 }
  0x25   :  { %p266_p3 = scmp.lt.u32.totalorder %s262_s14, %s402_s2 }
  0x27   :  { %p268_p4 = pnand %p266_p3, %p263_p2 }
  0x29   :  { %271 = shalt.err (!%p268_p4)
}
  0x2a   :  { %s272_s20 = scalar_lea.vmem %s53_s11, 384  ;;  %p277_p6 = scmp.lt.s32.totalorder %s53_s11, %s53_s11 }
  0x2b   :  { %p273_p5 = scmp.ne.s32.totalorder %s53_s11, %s272_s20  ;;  %p278_p7 = scmp.lt.s32.totalorder %s272_s20, %s272_s20 }
  0x2d   :  { %p279_p8 = por %p278_p7, %p277_p6 }
  0x2f   :  { %p280_p9 = pnand %p279_p8, %p273_p5 }
  0x31   :  { %283 = shalt.err (!%p280_p9)
}
  0x32   :  { %58 = dma.hbm_to_vmem [thread:$0]  %s402_s2, 384, %s53_s11, [#allocation7], %s302_s24, %s302_s24, %s303_s25  }
  0x33   :  { %294 = dma.done.wait [#allocation4], 384  }
  0x34   :  { %295 = vsyncadd [#allocation4], 4294966912 }
  0x35   :  { %296 = dma.done.wait [#allocation7], 768  }
  0x36   :  { %297 = vsyncadd [#allocation7], 4294966528  ;;  %v87_v0 = vld [vmem:[#allocation6 + $0x10] sm:$0xf]  ;;  %v90_v1 = vld [vmem:[#allocation3 + $0x10] sm:$0xf] }
  0x37   :  { %v85_v2 = vld [vmem:[#allocation6] sm:$0xff]  ;;  %v93_v3 = vsub.f32 %v87_v0, %v90_v1  ;;  %v88_v4 = vld [vmem:[#allocation3] sm:$0xff]  ;;  %v89_v6 = vld [vmem:[#allocation3 + $0x8] sm:$0xff]  ;;  %vm104_vm0 = vcmask 257024   ;;  %vm97_vm1 = vcmask 261120   ;;  %vm80_vm2 = vcmask 7168  }
  0x38   :  { %v86_v5 = vld [vmem:[#allocation6 + $0x8] sm:$0xff]  ;;  %v91_v7 = vsub.f32 %v85_v2, %v88_v4  ;;  %vm83_vm3 = vcmask 3072   ;;  %v305_v15 = vmov 0.0   ;;  %v108_v48 = vld [vmem:[#allocation8] sm:$0xff]  ;;  %v109_v56 = vld [vmem:[#allocation8 + $0x8] sm:$0xff]  ;;  %s284_s23 = scalar_lea.hbm %s403_s3, 16 }
  0x39   :  { %v92_v8 = vsub.f32 %v86_v5, %v89_v6  ;;  %v96_v9 = vmul.f32 %v93_v3, %v93_v3  ;;  %81 = vst.msk [vmem:[#allocation2] sm:$0xff] %vm80_vm2, %v305_v15  ;;  %82 = vst.msk [vmem:[#allocation2 + $0x8] sm:$0xff] %vm80_vm2, %v305_v15  ;;  %v110_v41 = vld [vmem:[#allocation8 + $0x10] sm:$0xf]  ;;  %p285_p10 = scmp.ne.s32.totalorder %s403_s3, %s284_s23  ;;  %p288_p11 = scmp.lt.u32.totalorder %s284_s23, %s403_s3 }
  0x3a   :  { %v94_v10 = vmul.f32 %v91_v7, %v91_v7  ;;  %84 = vst.msk [vmem:[#allocation2 + $0x10] sm:$0xf] %vm83_vm3, %v305_v15 }
  0x3b   :  { %v95_v11 = vmul.f32 %v92_v8, %v92_v8  ;;  %v105_v12 = vsel %vm104_vm0, %v96_v9, 0.0  ;;  %p290_p12 = pnand %p288_p11, %p285_p10 }
  0x3c   :  { %106 = vadd.xlane.f32.xlu1 %v105_v12  ;;  %v98_v13 = vsel %vm97_vm1, %v94_v10, 0.0 }
  0x3d   :  { %99 = vadd.xlane.f32.xlu0 %v98_v13  ;;  %v101_v14 = vsel %vm97_vm1, %v95_v11, 0.0 }
  0x40   :  { %v156_v58 = vld [vmem:[#allocation2] sm:$0xff]  ;;  %v157_v0 = vld [vmem:[#allocation2 + $0x8] sm:$0xff] }
  0x41   :  { %102 = vadd.xlane.f32.xlu0 %v101_v14  ;;  %v158_v55 = vld [vmem:[#allocation2 + $0x10] sm:$0xf] }
  0xc9   :  { %v107_v16 = vpop.xlane.xlu1 %106 }
  0xca   :  { %212 = vrsqrt.f32 %v107_v16  ;;  %v100_v17 = vpop.xlane.xlu0 %99  ;;  %vm127_vm4 = vcmp.eq.f32.partialorder %v107_v16, inf  ;;  %v130_v22 = vand.u32 2147483648, %v107_v16  ;;  %vm129_vm5 = vcmp.eq.f32.partialorder %v107_v16, 0.0 }
  0xcb   :  { %214 = vrsqrt.f32 %v100_v17  ;;  %vm113_vm6 = vcmp.eq.f32.partialorder %v100_v17, inf  ;;  %v116_v25 = vand.u32 2147483648, %v100_v17  ;;  %vm115_vm7 = vcmp.eq.f32.partialorder %v100_v17, 0.0 }
  0xcc   :  { %v146_v43 = vmul.f32 0.1, %v107_v16  ;;  %v144_v45 = vmul.f32 0.1, %v100_v17 }
  0xce   :  { %v103_v18 = vpop.xlane.xlu0 %102 }
  0xcf   :  { %216 = vrsqrt.f32 %v103_v18  ;;  %vm120_vm8 = vcmp.eq.f32.partialorder %v103_v18, inf  ;;  %v123_v34 = vand.u32 2147483648, %v103_v18  ;;  %vm122_vm9 = vcmp.eq.f32.partialorder %v103_v18, 0.0 }
  0xd0   :  { %v145_v54 = vmul.f32 0.1, %v103_v18 }
  0xd4   :  { %v213_v19 = vpop.eup %212 }
  0xd5   :  { %v215_v20 = vpop.eup %214  ;;  %v126_v21 = vmul.f32 %v213_v19, %v107_v16 }
  0xd6   :  { %v112_v23 = vmul.f32 %v215_v20, %v100_v17 }
  0xd7   :  { %v128_v24 = vsel %vm127_vm4, %v107_v16, %v126_v21 }
  0xd8   :  { %v131_v26 = vsel %vm129_vm5, %v130_v22, %v128_v24  ;;  %v114_v27 = vsel %vm113_vm6, %v100_v17, %v112_v23 }
  0xd9   :  { %v217_v28 = vpop.eup %216  ;;  %v134_v29 = vsub.f32 1.0, %v131_v26  ;;  %v117_v30 = vsel %vm115_vm7, %v116_v25, %v114_v27 }
  0xda   :  { %v132_v31 = vsub.f32 1.0, %v117_v30  ;;  %v119_v32 = vmul.f32 %v217_v28, %v103_v18 }
  0xdb   :  { %v137_v33 = vmax.f32 %v134_v29, 0.0 }
  0xdc   :  { %v135_v35 = vmax.f32 %v132_v31, 0.0  ;;  %v121_v36 = vsel %vm120_vm8, %v103_v18, %v119_v32 }
  0xdd   :  { %v140_v37 = vmul.f32 %v137_v33, %v137_v33  ;;  %v124_v38 = vsel %vm122_vm9, %v123_v34, %v121_v36 }
  0xde   :  { %v138_v39 = vmul.f32 %v135_v35, %v135_v35  ;;  %v133_v40 = vsub.f32 1.0, %v124_v38 }
  0xdf   :  { %v143_v42 = vmul.f32 0.9, %v140_v37 }
  0xe0   :  { %v141_v44 = vmul.f32 0.9, %v138_v39  ;;  %v136_v46 = vmax.f32 %v133_v40, 0.0 }
  0xe1   :  { %v149_v47 = vsub.f32 %v146_v43, %v143_v42 }
  0xe2   :  { %v147_v49 = vsub.f32 %v144_v45, %v141_v44  ;;  %v139_v50 = vmul.f32 %v136_v46, %v136_v46 }
  0xe3   :  { %v152_v51 = vmul.f32 %v149_v47, %v110_v41 }
  0xe4   :  { %v150_v52 = vmul.f32 %v147_v49, %v108_v48  ;;  %v142_v53 = vmul.f32 0.9, %v139_v50 }
  0xe5   :  { %v155_v57 = vadd.f32 %v152_v51, %v143_v42 }
  0xe6   :  { %v153_v59 = vadd.f32 %v150_v52, %v141_v44  ;;  %v148_v60 = vsub.f32 %v145_v54, %v142_v53 }
  0xe7   :  { %v161_v61 = vadd.f32 %v158_v55, %v155_v57 }
  0xe8   :  { %v151_v62 = vmul.f32 %v148_v60, %v109_v56  ;;  %v159_v63 = vadd.f32 %v156_v58, %v153_v59 }
  0xe9   :  { %166 = vst.msk [vmem:[#allocation2 + $0x10] sm:$0xf] %vm83_vm3, %v161_v61 }
  0xea   :  { %v154_v1 = vadd.f32 %v151_v62, %v142_v53  ;;  %163 = vst.msk [vmem:[#allocation2] sm:$0xff] %vm80_vm2, %v159_v63 }
  0xec   :  { %v160_v2 = vadd.f32 %v157_v0, %v154_v1 }
  0xee   :  { %164 = vst.msk [vmem:[#allocation2 + $0x8] sm:$0xff] %vm80_vm2, %v160_v2 }
  0xf0   :  { %v171_v5 = vld [vmem:[#allocation2 + $0x10] sm:$0xf] }
  0xf1   :  { %v169_v3 = vld [vmem:[#allocation2] sm:$0xff]  ;;  %v175_v9 = vsel %vm83_vm3, %v171_v5, 0.0 }
  0xf2   :  { %v172_v6 = vsel %vm80_vm2, %v169_v3, 0.0 }
  0xf5   :  { %v170_v4 = vld [vmem:[#allocation2 + $0x8] sm:$0xff] }
  0xf6   :  { %v173_v7 = vsel %vm80_vm2, %v170_v4, 0.0 }
  0xf7   :  { %v174_v8 = vadd.f32 %v173_v7, %v172_v6 }
  0xf9   :  { %v176_v10 = vadd.f32 %v175_v9, %v174_v8 }
  0xfb   :  { %177 = vadd.xlane.f32.xlu1 %v176_v10 }
 0x188   :  { %v178_v11 = vpop.xlane.xlu1 %177 }
 0x189   :  { %v179_v12 = vrot.slane %v178_v11, 4 }
 0x18b   :  { %v180_v13 = vadd.f32 %v179_v12, %v178_v11 }
 0x18d   :  { %v181_v14 = vrot.slane %v180_v13, 2 }
 0x18f   :  { %v182_v15 = vadd.f32 %v181_v14, %v180_v13 }
 0x191   :  { %v183_v16 = vrot.slane %v182_v15, 1 }
 0x193   :  { %v184_v17 = vadd.f32 %v183_v16, %v182_v15 }
 0x195   :  { %203 = vpush %v184_v17 }
 0x1c6   :  { %s204_s2 = spop %203 }
 0x1c7   :  { %187 = sst [smem:[#allocation9]] %s204_s2 }
 0x1c8   :  { %293 = shalt.err (!%p290_p12)
}
 0x1c9   :  { %s306_s28 = smov [#allocation9]  }
 0x1ca   :  { %195 = dma.smem_to_hbm %s306_s28, 16, %s403_s3, [#allocation5]  }
 0x1cb   :  { %298 = dma.done.wait [#allocation5], 16  }
 0x1cc   :  { %299 = vsyncadd [#allocation5], 4294967280 }
 0x1cd   :  { %199 = sfence }
 0x1ce   :  { %200 = vsyncpa [#allocation4], 1 }
 0x1cf   :  { %201 = vsyncpa [#allocation7], 1 }
 0x1d0   :  { %202 = vsyncpa [#allocation5], 1 }

</bundles_post_ra>
